<compile_context>
chip_gen: v6e
topology: v6e:2x2x1
jax: 0.10.0
libtpu: 0.0.40
codegen_flags: <defaults>
</compile_context>

<pallas_src>
import math
import functools

import jax
import jax.numpy as jnp
from jax import lax
from jax.experimental import pallas as pl
from jax.experimental.pallas import tpu as pltpu

NEG_INF = -1e10  # same masking constant as the torch module


def _pick_tile(dim, candidates):
    """Largest candidate tile that exactly divides `dim`, else the full dim."""
    for c in candidates:
        if c <= dim and dim % c == 0:
            return c
    return dim


# ----------------------------------------------------------------------------
# Kernel 1: Conv1D  (== torch.addmm : out = bias + x @ W), tiled K-reduction
# ----------------------------------------------------------------------------
def _linear_kernel(x_ref, w_ref, b_ref, o_ref, acc_ref, *, compute_dtype):
    @pl.when(pl.program_id(2) == 0)
    def _init():
        acc_ref[...] = jnp.zeros_like(acc_ref)

    acc_ref[...] += jnp.dot(
        x_ref[...].astype(compute_dtype),
        w_ref[...].astype(compute_dtype),
        preferred_element_type=jnp.float32)

    @pl.when(pl.program_id(2) == pl.num_programs(2) - 1)
    def _flush():
        o_ref[...] = (acc_ref[...] + b_ref[...]).astype(o_ref.dtype)


def conv1d(x, w, b, compute_dtype=None):
    """x: (B, T, nx), w: (nx, nf), b: (nf,) -> (B, T, nf)"""
    B, T, nx = x.shape
    nf = w.shape[1]
    M = B * T
    compute_dtype = compute_dtype or x.dtype
    tm = _pick_tile(M, (512, 256, 128))
    tn = _pick_tile(nf, (512, 256, 128))
    tk = _pick_tile(nx, (512, 256, 128))
    x2 = x.reshape(M, nx)
    out = pl.pallas_call(
        functools.partial(_linear_kernel, compute_dtype=compute_dtype),
        out_shape=jax.ShapeDtypeStruct((M, nf), x.dtype),
        grid=(M // tm, nf // tn, nx // tk),
        in_specs=[
            pl.BlockSpec((tm, tk), lambda i, j, k: (i, k)),
            pl.BlockSpec((tk, tn), lambda i, j, k: (k, j)),
            pl.BlockSpec((1, tn), lambda i, j, k: (0, j)),
        ],
        out_specs=pl.BlockSpec((tm, tn), lambda i, j, k: (i, j)),
        scratch_shapes=[pltpu.VMEM((tm, tn), jnp.float32)],
        compiler_params=pltpu.CompilerParams(
            dimension_semantics=("parallel", "parallel", "arbitrary")),
    )(x2, w, b.reshape(1, nf))
    return out.reshape(B, T, nf)


# ----------------------------------------------------------------------------
# Kernel 2: causal self-attention, online softmax over KV tiles
# ----------------------------------------------------------------------------
def _self_attn_kernel(q_ref, k_ref, v_ref, o_ref, m_ref, l_ref, acc_ref,
                      *, scale, tq, tk, compute_dtype):
    qi = pl.program_id(2)
    kv = pl.program_id(3)
    q_start = qi * tq
    k_start = kv * tk
    d = q_ref.shape[-1]

    @pl.when(kv == 0)
    def _init():
        m_ref[...] = jnp.full_like(m_ref, -jnp.inf)
        l_ref[...] = jnp.zeros_like(l_ref)
        acc_ref[...] = jnp.zeros_like(acc_ref)

    # Skip KV tiles that lie entirely above the causal diagonal.
    @pl.when(q_start + tq - 1 >= k_start)
    def _compute():
        q = q_ref[0, 0].astype(compute_dtype)
        if scale:
            q = q * jnp.asarray(1.0 / math.sqrt(d), compute_dtype)
        k = k_ref[0, 0].astype(compute_dtype)
        s = lax.dot_general(q, k, (((1,), (1,)), ((), ())),
                            preferred_element_type=jnp.float32)     # (tq, tk)
        rows = q_start + lax.broadcasted_iota(jnp.int32, (tq, tk), 0)
        cols = k_start + lax.broadcasted_iota(jnp.int32, (tq, tk), 1)
        s = jnp.where(rows >= cols, s, NEG_INF)

        m_prev = m_ref[...]
        m_new = jnp.maximum(m_prev, jnp.max(s, axis=-1, keepdims=True))
        alpha = jnp.exp(m_prev - m_new)
        p = jnp.exp(s - m_new)
        l_ref[...] = alpha * l_ref[...] + jnp.sum(p, axis=-1, keepdims=True)
        acc_ref[...] = alpha * acc_ref[...] + lax.dot_general(
            p.astype(compute_dtype), v_ref[0, 0].astype(compute_dtype),
            (((1,), (0,)), ((), ())), preferred_element_type=jnp.float32)
        m_ref[...] = m_new

    @pl.when(kv == pl.num_programs(3) - 1)
    def _finalize():
        inv = pl.reciprocal(l_ref[...], approx=True)
        o_ref[0, 0] = (acc_ref[...] * inv).astype(o_ref.dtype)


def self_attention(q, k, v, scale, compute_dtype=None):
    """q,k,v: (B, H, T, D) -> (B, H, T, D)"""
    B, H, T, D = q.shape
    compute_dtype = compute_dtype or q.dtype
    tq = _pick_tile(T, (256, 128))
    tk = _pick_tile(T, (512, 256, 128))
    qspec = pl.BlockSpec((1, 1, tq, D), lambda b, h, i, j: (b, h, i, 0))
    kvspec = pl.BlockSpec((1, 1, tk, D), lambda b, h, i, j: (b, h, j, 0))
    return pl.pallas_call(
        functools.partial(_self_attn_kernel, scale=scale, tq=tq, tk=tk,
                          compute_dtype=compute_dtype),
        out_shape=jax.ShapeDtypeStruct((B, H, T, D), q.dtype),
        grid=(B, H, T // tq, T // tk),
        in_specs=[qspec, kvspec, kvspec],
        out_specs=qspec,
        scratch_shapes=[pltpu.VMEM((tq, 1), jnp.float32),
                        pltpu.VMEM((tq, 1), jnp.float32),
                        pltpu.VMEM((tq, D), jnp.float32)],
        compiler_params=pltpu.CompilerParams(
            dimension_semantics=("parallel", "parallel", "parallel",
                                 "arbitrary")),
    )(q, k, v)


# ----------------------------------------------------------------------------
# Kernel 3: dual attention (y attends causally to x, and to itself diagonally)
# ----------------------------------------------------------------------------
def _dual_attn_kernel(kx_ref, vx_ref, qy_ref, ky_ref, vy_ref, o_ref, w_ref,
                      *, scale, tq, compute_dtype):
    qi = pl.program_id(2)
    q_start = qi * tq
    d = qy_ref.shape[-1]
    T = kx_ref.shape[-2]

    qy = qy_ref[0, 0].astype(compute_dtype)          # (tq, D)
    if scale:
        qy = qy * jnp.asarray(1.0 / math.sqrt(d), compute_dtype)
    kx = kx_ref[0, 0].astype(compute_dtype)          # (T, D)
    ky = ky_ref[0, 0].astype(compute_dtype)          # (tq, D)

    # y -> x scores with in-kernel causal mask (no DMA'd tril).
    sx = lax.dot_general(qy, kx, (((1,), (1,)), ((), ())),
                         preferred_element_type=jnp.float32)          # (tq, T)
    rows = q_start + lax.broadcasted_iota(jnp.int32, (tq, T), 0)
    cols = lax.broadcasted_iota(jnp.int32, (tq, T), 1)
    sx = jnp.where(rows >= cols, sx, NEG_INF)

    # y -> y is eye-masked: only the diagonal survives, so a row-wise
    # multiply-reduce replaces the full (tq, T) matmul.
    sd = jnp.sum((qy * ky).astype(jnp.float32), axis=-1, keepdims=True)  # (tq,1)

    m = jnp.maximum(jnp.max(sx, axis=-1, keepdims=True), sd)
    ex = jnp.exp(sx - m)
    ed = jnp.exp(sd - m)
    inv = pl.reciprocal(jnp.sum(ex, axis=-1, keepdims=True) + ed, approx=True)
    px = ex * inv                                                     # (tq, T)
    pd = ed * inv                                                     # (tq, 1)

    o = lax.dot_general(px.astype(compute_dtype),
                        vx_ref[0, 0].astype(compute_dtype),
                        (((1,), (0,)), ((), ())),
                        preferred_element_type=jnp.float32)
    o = o + pd * vy_ref[0, 0].astype(jnp.float32)
    o_ref[0, 0] = o.astype(o_ref.dtype)

    # required module output: full (tq, 2T) attention weights, written once.
    wy = jnp.where(rows == cols, pd, 0.0)            # y->y half: diagonal only
    w_ref[0, 0] = jnp.concatenate((px, wy), axis=-1).astype(w_ref.dtype)


def dual_attention(kx, vx, qy, ky, vy, scale, compute_dtype=None):
    """per-head tensors (B, H, T, D) -> ((B,H,T,D), (B,H,T,2T))"""
    B, H, T, D = qy.shape
    compute_dtype = compute_dtype or qy.dtype
    tq = _pick_tile(T, (256, 128))
    xspec = pl.BlockSpec((1, 1, T, D), lambda b, h, i: (b, h, 0, 0))
    yspec = pl.BlockSpec((1, 1, tq, D), lambda b, h, i: (b, h, i, 0))
    wspec = pl.BlockSpec((1, 1, tq, 2 * T), lambda b, h, i: (b, h, i, 0))
    return pl.pallas_call(
        functools.partial(_dual_attn_kernel, scale=scale, tq=tq,
                          compute_dtype=compute_dtype),
        out_shape=(jax.ShapeDtypeStruct((B, H, T, D), qy.dtype),
                   jax.ShapeDtypeStruct((B, H, T, 2 * T), jnp.float32)),
        grid=(B, H, T // tq),
        in_specs=[xspec, xspec, yspec, yspec, yspec],
        out_specs=(yspec, wspec),
        compiler_params=pltpu.CompilerParams(
            dimension_semantics=("parallel", "parallel", "parallel")),
    )(kx, vx, qy, ky, vy)


# ----------------------------------------------------------------------------
# Module wrapper (glue in plain JAX)
# ----------------------------------------------------------------------------
class AttentionPallas:
    def __init__(self, nx, n_ctx, config, scale=False, key=None,
                 matmul_dtype=None):
        assert nx % config["n_head"] == 0
        self.n_head = config["n_head"]
        self.split_size = nx
        self.scale = scale
        self.n_ctx = n_ctx
        # None -> matmuls run in the input dtype; jnp.bfloat16 -> bf16 MXU
        # inputs with f32 accumulation (perf path on v5e/v6e/v7x).
        self.matmul_dtype = matmul_dtype
        # registered buffers (kept for parity with the torch module; kernels
        # regenerate the masks via iota so these are only used by the ref).
        self.bias = jnp.tril(jnp.ones((n_ctx, n_ctx), jnp.float32))
        self.spot = jnp.eye(n_ctx, dtype=jnp.float32)
        # Conv1D params, init.normal_(std=0.02), bias zeros — deterministic
        k1, k2 = jax.random.split(key)
        self.c_attn_w = 0.02 * jax.random.normal(k1, (nx, nx * 3), jnp.float32)
        self.c_attn_b = jnp.zeros((nx * 3,), jnp.float32)
        self.c_proj_w = 0.02 * jax.random.normal(k2, (nx, nx), jnp.float32)
        self.c_proj_b = jnp.zeros((nx,), jnp.float32)

    def _split_qkv_heads(self, c):
        # (B, T, 3*nx) -> 3 x (B, H, T, D) with one fused relayout (instead of
        # three splits + three transposes).
        # TODO(synk): when head_dim % 128 == 0 this relayout can be removed by
        # slicing q/k/v/head directly in the attention BlockSpec index_maps.
        B, T, _ = c.shape
        H, D = self.n_head, self.split_size // self.n_head
        c = c.reshape(B, T, 3, H, D).transpose(2, 0, 3, 1, 4)   # (3,B,H,T,D)
        return c[0], c[1], c[2]

    def merge_heads(self, x):
        B, H, T, D = x.shape
        return x.transpose(0, 2, 1, 3).reshape(B, T, H * D)

    def __call__(self, x, y=None):
        dt = self.matmul_dtype
        cx = conv1d(x, self.c_attn_w, self.c_attn_b, dt)
        qx, kx, vx = self._split_qkv_heads(cx)
        if y is None:
            a = self_attention(qx, kx, vx, self.scale, dt)
            w = None
        else:
            cy = conv1d(y, self.c_attn_w, self.c_attn_b, dt)
            qy, ky, vy = self._split_qkv_heads(cy)
            a, w = dual_attention(kx, vx, qy, ky, vy, self.scale, dt)
        a = self.merge_heads(a)
        a = conv1d(a, self.c_proj_w, self.c_proj_b, dt)
        # attn_dropout / resid_dropout: identity (eval mode)
        if y is None:
            return a
        return a, w


# ----------------------------------------------------------------------------
# Pure-JAX reference (mirrors the PyTorch math) for verification
# ----------------------------------------------------------------------------
def _ref_forward(mod, x, y=None):
    def lin(t, w, b):
        return t @ w + b

    def split(t):
        B, T, nx = t.shape
        return t.reshape(B, T, mod.n_head, nx // mod.n_head).transpose(0, 2, 1, 3)

    cx = lin(x, mod.c_attn_w, mod.c_attn_b)
    qx, kx, vx = jnp.split(cx, 3, axis=2)
    qx, kx, vx = map(split, (qx, kx, vx))
    T = x.shape[1]
    tril = mod.bias[:T, :T]
    if y is None:
        w = jnp.einsum("bhqd,bhkd->bhqk", qx, kx)
        if mod.scale:
            w = w / math.sqrt(vx.shape[-1])
        w = w * tril - 1e10 * (1 - tril)
        w = jax.nn.softmax(w, axis=-1)
        a = jnp.einsum("bhqk,bhkd->bhqd", w, vx)
        wret = None
    else:
        cy = lin(y, mod.c_attn_w, mod.c_attn_b)
        qy, ky, vy = jnp.split(cy, 3, axis=2)
        qy, ky, vy = map(split, (qy, ky, vy))
        y2x = jnp.einsum("bhqd,bhkd->bhqk", qy, kx)
        y2y = jnp.einsum("bhqd,bhkd->bhqk", qy, ky)
        if mod.scale:
            y2x = y2x / math.sqrt(vx.shape[-1])
            y2y = y2y / math.sqrt(vy.shape[-1])
        eye = mod.spot[:T, :T]
        y2x = y2x * tril - 1e10 * (1 - tril)
        y2y = y2y * eye - 1e10 * (1 - eye)
        w = jax.nn.softmax(jnp.concatenate((y2x, y2y), -1), axis=-1)
        v = jnp.concatenate((vx, vy), axis=-2)
        a = jnp.einsum("bhqk,bhkd->bhqd", w, v)
        wret = w
    B, H, Tq, D = a.shape
    a = a.transpose(0, 2, 1, 3).reshape(B, Tq, H * D)
    a = lin(a, mod.c_proj_w, mod.c_proj_b)
    return a if y is None else (a, wret)


if __name__ == "__main__":
    B, T, NX, NHEAD = 2, 8, 32, 4
    config = {"n_head": NHEAD, "attn_pdrop": 0.0, "resid_pdrop": 0.0}

    root = jax.random.PRNGKey(0)
    kparam, kx_in, ky_in = jax.random.split(root, 3)
    mod = AttentionPallas(NX, n_ctx=T, config=config, scale=True, key=kparam)

    x = jax.random.normal(kx_in, (B, T, NX), jnp.float32)
    y = jax.random.normal(ky_in, (B, T, NX), jnp.float32)

    # self-attention path (y is None)
    out_self = jax.block_until_ready(mod(x))
    ref_self = _ref_forward(mod, x)
    assert jnp.allclose(out_self, ref_self, atol=2e-3, rtol=2e-3)

    # dual-attention path (y provided)
    out_dual, w_dual = mod(x, y)
    out_dual = jax.block_until_ready(out_dual)
    w_dual = jax.block_until_ready(w_dual)
    ref_dual, ref_w = _ref_forward(mod, x, y)
    assert jnp.allclose(out_dual, ref_dual, atol=2e-3, rtol=2e-3)
    assert jnp.allclose(w_dual, ref_w, atol=2e-3, rtol=2e-3)

    # bf16-MXU perf path (f32 accumulation); loose check against f32 reference
    mod_bf16 = AttentionPallas(NX, n_ctx=T, config=config, scale=True,
                               key=kparam, matmul_dtype=jnp.bfloat16)
    out_bf16 = jax.block_until_ready(mod_bf16(x))
    assert jnp.allclose(out_bf16, ref_self, atol=1e-1, rtol=1e-1)

    print("KERNEL_OK")
</pallas_src>

<mosaic_0001>
module attributes {stable_mosaic.version = 11 : i64} {
  func.func @_linear_kernel(%arg0: i32, %arg1: i32, %arg2: i32, %arg3: memref<16x32xf32, #tpu.memory_space<vmem>>, %arg4: memref<32x96xf32, #tpu.memory_space<vmem>>, %arg5: memref<1x96xf32, #tpu.memory_space<vmem>>, %arg6: memref<16x96xf32, #tpu.memory_space<vmem>>, %arg7: memref<16x96xf32, #tpu.memory_space<vmem>>) attributes {dimension_semantics = [#tpu.dimension_semantics<parallel>, #tpu.dimension_semantics<parallel>, #tpu.dimension_semantics<arbitrary>], iteration_bounds = array<i64: 1, 1, 1>, scalar_prefetch = 0 : i64, scratch_operands = 1 : i64, tpu.core_type = #tpu.core_type<tc>, window_params = [{transform_indices = @transform_0, window_bounds = array<i64: 16, 32>}, {transform_indices = @transform_1, window_bounds = array<i64: 32, 96>}, {transform_indices = @transform_2, window_bounds = array<i64: 1, 96>}, {transform_indices = @transform_3, window_bounds = array<i64: 16, 96>}]} {
    %c0_i32 = arith.constant 0 : i32
    %0 = arith.cmpi eq, %arg2, %c0_i32 : i32
    %1 = arith.extui %0 : i1 to i32
    %c0_i32_0 = arith.constant 0 : i32
    %2 = arith.cmpi ne, %1, %c0_i32_0 : i32
    scf.if %2 {
      %cst_10 = arith.constant 0.000000e+00 : f32
      %12 = vector.broadcast %cst_10 : f32 to vector<16x96xf32>
      %c0_11 = arith.constant 0 : index
      %c0_12 = arith.constant 0 : index
      %13 = vector.load %arg7[%c0_11, %c0_12] : memref<16x96xf32, #tpu.memory_space<vmem>>, vector<16x96xf32>
      tpu.vector_store %arg7[%c0_11, %c0_12], %12 {strides = array<i32>} : memref<16x96xf32, #tpu.memory_space<vmem>>, vector<16x96xf32>,
    } else {
    }
    %c0 = arith.constant 0 : index
    %c0_1 = arith.constant 0 : index
    %3 = vector.load %arg7[%c0, %c0_1] : memref<16x96xf32, #tpu.memory_space<vmem>>, vector<16x96xf32>
    %c0_2 = arith.constant 0 : index
    %c0_3 = arith.constant 0 : index
    %4 = vector.load %arg3[%c0_2, %c0_3] : memref<16x32xf32, #tpu.memory_space<vmem>>, vector<16x32xf32>
    %c0_4 = arith.constant 0 : index
    %c0_5 = arith.constant 0 : index
    %5 = vector.load %arg4[%c0_4, %c0_5] : memref<32x96xf32, #tpu.memory_space<vmem>>, vector<32x96xf32>
    %cst = arith.constant dense<0.000000e+00> : vector<16x96xf32>
    %6 = tpu.matmul %4, %5, %cst {dimension_numbers = #tpu.dot_dimension_numbers<[1], [0], [0], [1], [0, 0, 1, 1], [], []>} : vector<16x32xf32>, vector<32x96xf32>, vector<16x96xf32> -> vector<16x96xf32>
    %7 = arith.addf %3, %6 : vector<16x96xf32>
    %c0_6 = arith.constant 0 : index
    %c0_7 = arith.constant 0 : index
    %8 = vector.load %arg7[%c0_6, %c0_7] : memref<16x96xf32, #tpu.memory_space<vmem>>, vector<16x96xf32>
    tpu.vector_store %arg7[%c0_6, %c0_7], %7 {strides = array<i32>} : memref<16x96xf32, #tpu.memory_space<vmem>>, vector<16x96xf32>,
    %c0_i32_8 = arith.constant 0 : i32
    %9 = arith.cmpi eq, %arg2, %c0_i32_8 : i32
    %10 = arith.extui %9 : i1 to i32
    %c0_i32_9 = arith.constant 0 : i32
    %11 = arith.cmpi ne, %10, %c0_i32_9 : i32
    scf.if %11 {
      %c0_10 = arith.constant 0 : index
      %c0_11 = arith.constant 0 : index
      %12 = vector.load %arg7[%c0_10, %c0_11] : memref<16x96xf32, #tpu.memory_space<vmem>>, vector<16x96xf32>
      %c0_12 = arith.constant 0 : index
      %c0_13 = arith.constant 0 : index
      %13 = vector.load %arg5[%c0_12, %c0_13] : memref<1x96xf32, #tpu.memory_space<vmem>>, vector<1x96xf32>
      %14 = vector.broadcast %13 : vector<1x96xf32> to vector<16x96xf32>
      %15 = arith.addf %12, %14 : vector<16x96xf32>
      %c0_14 = arith.constant 0 : index
      %c0_15 = arith.constant 0 : index
      %16 = vector.load %arg6[%c0_14, %c0_15] : memref<16x96xf32, #tpu.memory_space<vmem>>, vector<16x96xf32>
      tpu.vector_store %arg6[%c0_14, %c0_15], %15 {strides = array<i32>} : memref<16x96xf32, #tpu.memory_space<vmem>>, vector<16x96xf32>,
    } else {
    }
    return
  }
  func.func @transform_0(%arg0: i32, %arg1: i32, %arg2: i32) -> (i32, i32) {
    %c0_i32 = arith.constant 0 : i32
    return %arg0, %arg2 : i32, i32
  }
  func.func @transform_1(%arg0: i32, %arg1: i32, %arg2: i32) -> (i32, i32) {
    %c0_i32 = arith.constant 0 : i32
    return %arg2, %arg1 : i32, i32
  }
  func.func @transform_2(%arg0: i32, %arg1: i32, %arg2: i32) -> (i32, i32) {
    %c0_i32 = arith.constant 0 : i32
    %c0_i32_0 = arith.constant 0 : i32
    return %c0_i32, %arg1 : i32, i32
  }
  func.func @transform_3(%arg0: i32, %arg1: i32, %arg2: i32) -> (i32, i32) {
    %c0_i32 = arith.constant 0 : i32
    return %arg0, %arg1 : i32, i32
  }
}

</mosaic_0001>

<bundles_post_ra>
// kernel: tpu_custom_call.1
= control target key start
LH: loop header
LB: loop body
LE: loop exit
PB: predicated region body
PF: predicated region fallthrough
CT: control target
= control target key end

     0   :  { %8 = vsyncpa [#allocation4], 0  ;;  %s326_s0 = inlined_call_operand.hbm [shape: f32[16,32], index: 0, kind: input, shape index: {}]   ;;  %s327_s1 = inlined_call_operand.hbm [shape: f32[32,96], index: 1, kind: input, shape index: {}]   ;;  %s328_s2 = inlined_call_operand.vmem [shape: f32[1,96], index: 2, kind: input, shape index: {}]   ;;  %s329_s3 = inlined_call_operand.hbm [shape: f32[16,96], index: 3, kind: output, shape index: {}]  }
   0x1   :  { %9 = vsyncpa [#allocation7], 0 }
   0x2   :  { %10 = vsyncpa [#allocation5], 0  ;;  %s271_s12 = smov [#allocation3]  }
   0x3   :  { %s16_s13 = sshll.u32 %s271_s12, 4  ;;  %s17_s13 = int_to_ptr.vmem [resolvable:$true] %s16_s13 }
   0x4   :  { %s213_s14 = scalar_lea.vmem %s17_s13, 256  ;;  %p218_p1 = scmp.lt.s32.totalorder %s17_s13, %s17_s13 }
   0x5   :  { %p214_p0 = scmp.ne.s32.totalorder %s17_s13, %s213_s14  ;;  %p219_p2 = scmp.lt.s32.totalorder %s213_s14, %s213_s14 }
   0x7   :  { %p220_p3 = por %p219_p2, %p218_p1 }
   0x9   :  { %p221_p4 = pnand %p220_p3, %p214_p0 }
   0xb   :  { %224 = shalt.err (!%p221_p4)
}
   0xc   :  { %s272_s15 = smov 128   ;;  %s273_s16 = smov 8  }
   0xd   :  { %22 = dma.hbm_to_vmem [thread:$0]  %s326_s0, 256, %s17_s13, [#allocation4], %s272_s15, %s272_s15, %s273_s16  }
   0xe   :  { %s274_s19 = smov [#allocation6]  }
   0xf   :  { %s28_s20 = sshll.u32 %s274_s19, 4  ;;  %s29_s20 = int_to_ptr.vmem [resolvable:$true] %s28_s20 }
  0x10   :  { %s233_s21 = scalar_lea.vmem %s29_s20, 512  ;;  %p238_p6 = scmp.lt.s32.totalorder %s29_s20, %s29_s20 }
  0x11   :  { %p234_p5 = scmp.ne.s32.totalorder %s29_s20, %s233_s21  ;;  %p239_p7 = scmp.lt.s32.totalorder %s233_s21, %s233_s21 }
  0x13   :  { %p240_p8 = por %p239_p7, %p238_p6 }
  0x15   :  { %p241_p9 = pnand %p240_p8, %p234_p5 }
  0x17   :  { %244 = shalt.err (!%p241_p9)
}
  0x18   :  { %34 = dma.hbm_to_vmem [thread:$0]  %s327_s1, 512, %s29_s20, [#allocation7], %s272_s15, %s272_s15, %s273_s16  }
  0x19   :  { %265 = dma.done.wait [#allocation4], 256  }
  0x1a   :  { %266 = vsyncadd [#allocation4], 4294967040 }
  0x1b   :  { %267 = dma.done.wait [#allocation7], 512  }
  0x1c   :  { %268 = vsyncadd [#allocation7], 4294966784  ;;  %vm47_vm0 = vcmask 785408   ;;  %v275_v0 = vmov 0.0   ;;  %vm58_vm1 = vcmask 261120   ;;  %v57_v1 = vld [vmem:[#allocation6 + $0x18] sm:$0xff] }
  0x1d   :  { %49 = vst.msk [vmem:[#allocation2 + $0x8] sm:$0xff] %vm47_vm0, %v275_v0  ;;  %48 = vst.msk [vmem:[#allocation2] sm:$0xff] %vm47_vm0, %v275_v0  ;;  %v56_v2 = vld [vmem:[#allocation6 + $0x10] sm:$0xff]  ;;  %188 = vmatprep.subr.mxu0 %v57_v1  ;;  %v55_v4 = vld [vmem:[#allocation6 + $0x8] sm:$0xff]  ;;  %s276_s24 = smov [#allocation8]  }
  0x1e   :  { %v52_v3 = vld [vmem:[#allocation3] sm:$0xff]  ;;  %189 = vmatpush3.msra.mxu0 %v57_v1  ;;  %v54_v5 = vld [vmem:[#allocation6] sm:$0xff]  ;;  %v53_v6 = vld [vmem:[#allocation3 + $0x8] sm:$0xff]  ;;  %s166_s25 = sshll.u32 %s276_s24, 4  ;;  %s167_s25 = int_to_ptr.vmem [resolvable:$true] %s166_s25 }
  0x1f   :  { %196 = vmatprep.mubr.msk.f32.mxu0 %vm58_vm1, %v52_v3  ;;  %190 = vmatprep.subr.mxu0 %v56_v2  ;;  %v181_v13 = vld [vmem:[%s328_s2] ss:$0 sm:$0xff]  ;;  %s245_s26 = scalar_lea.vmem %s167_s25, 256  ;;  %p250_p11 = scmp.lt.s32.totalorder %s167_s25, %s167_s25 }
  0x20   :  { %191 = vmatpush3.msra.mxu0 %v56_v2  ;;  %p246_p10 = scmp.ne.s32.totalorder %s167_s25, %s245_s26  ;;  %p251_p12 = scmp.lt.s32.totalorder %s245_s26, %s245_s26 }
  0x21   :  { %192 = vmatprep.subr.mxu0 %v55_v4 }
  0x22   :  { %193 = vmatpush3.msra.mxu0 %v55_v4  ;;  %p252_p13 = por %p251_p12, %p250_p11 }
  0x23   :  { %194 = vmatprep.subr.mxu0 %v54_v5 }
  0x24   :  { %195 = vmatpush3.msra.mxu0 %v54_v5  ;;  %v51_v7 = vld [vmem:[#allocation2 + $0x8] sm:$0xff]  ;;  %v50_v9 = vld [vmem:[#allocation2] sm:$0xff]  ;;  %p253_p0 = pnand %p252_p13, %p246_p10 }
  0x25   :  { %197 = vmatmul.mubr.msk.f32.vlgmr.msra.gmra.mxu0 %vm58_vm1, %v53_v6 }
  0xe5   :  { %v198_v8 = vpop.f32.mrf.mxu0 }
  0xe6   :  { %v141_v10 = vadd.f32 %v198_v8, %v51_v7 }
  0xe7   :  { %v131_v11 = vpop.f32.mrf.mxu0 }
  0xe8   :  { %144 = vst.msk [vmem:[#allocation2 + $0x8] sm:$0xff] %vm47_vm0, %v141_v10  ;;  %v140_v12 = vadd.f32 %v131_v11, %v50_v9 }
  0xea   :  { %143 = vst.msk [vmem:[#allocation2] sm:$0xff] %vm47_vm0, %v140_v12 }
  0xef   :  { %v149_v14 = vld [vmem:[#allocation2 + $0x8] sm:$0xff] }
  0xf0   :  { %v158_v15 = vadd.f32 %v181_v13, %v149_v14 }
  0xf1   :  { %v148_v16 = vld [vmem:[#allocation2] sm:$0xff] }
  0xf2   :  { %v157_v17 = vadd.f32 %v181_v13, %v148_v16  ;;  %160 = vst.msk [vmem:[#allocation8 + $0x8] sm:$0xff] %vm47_vm0, %v158_v15 }
  0xf4   :  { %159 = vst.msk [vmem:[#allocation8] sm:$0xff] %vm47_vm0, %v157_v17 }
  0xf5   :  { %256 = shalt.err (!%p253_p0)
}
  0xf6   :  { %172 = dma.vmem_to_hbm [thread:$0]  %s167_s25, 256, %s329_s3, [#allocation5], %s272_s15, %s272_s15, %s273_s16  }
  0xf7   :  { %269 = dma.done.wait [#allocation5], 256  }
  0xf8   :  { %270 = vsyncadd [#allocation5], 4294967040 }
  0xf9   :  { %176 = vsyncpa [#allocation4], 1 }
  0xfa   :  { %177 = vsyncpa [#allocation7], 1 }
  0xfb   :  { %178 = vsyncpa [#allocation5], 1 }

</bundles_post_ra>
